<compile_context>
chip_gen: v5e
topology: v5e:2x2
jax: 0.10.0
libtpu: 0.0.40
codegen_flags: <defaults>
</compile_context>

<pallas_src>
import functools

import jax
import jax.numpy as jnp
from jax.experimental import pallas as pl
from jax.experimental.pallas import tpu as pltpu


# ----------------------------------------------------------------------------
# Kernel 1: LeakyReLU + 3x3 conv (3 Toeplitz matmuls) + per-image BN partial sums
# ----------------------------------------------------------------------------
def _conv_stats_kernel(x_ref, t_ref, y_ref, s1_ref, s2_ref, *, negative_slope):
    # x_ref : (1, H, W*C)   one image, NHWC with (W, C) fused on the lane axis
    # t_ref : (3, W*C, W*C) width-Toeplitz conv weight, one matrix per kernel row
    # y_ref : (1, H, W*C)   conv output (pre-BN)
    # s1_ref: (1, 1, W*C)   per-image, per-(w,c) sum of y       (BN mean partial)
    # s2_ref: (1, 1, W*C)   per-image, per-(w,c) sum of y * y   (BN var partial)
    H = x_ref.shape[1]
    WC = x_ref.shape[2]

    x = x_ref[0]                                          # (H, W*C)
    a = jnp.where(x >= 0, x, x * negative_slope)          # LeakyReLU

    zero_row = jnp.zeros((1, WC), dtype=jnp.float32)

    # Kernel row kh = 1 (aligned output/input rows).
    y = jnp.dot(a, t_ref[1], preferred_element_type=jnp.float32)
    # Kernel row kh = 0: output row h reads input row h-1 (top row -> zero pad).
    z0 = jnp.dot(a, t_ref[0], preferred_element_type=jnp.float32)
    y = y + jnp.concatenate([zero_row, z0[:H - 1, :]], axis=0)
    # Kernel row kh = 2: output row h reads input row h+1 (bottom row -> zero pad).
    z2 = jnp.dot(a, t_ref[2], preferred_element_type=jnp.float32)
    y = y + jnp.concatenate([z2[1:, :], zero_row], axis=0)

    y_ref[0] = y.astype(y_ref.dtype)
    s1_ref[0] = jnp.sum(y, axis=0, keepdims=True)
    s2_ref[0] = jnp.sum(y * y, axis=0, keepdims=True)


# ----------------------------------------------------------------------------
# Kernel 2: apply BatchNorm scale/shift (second gridded pass)
# ----------------------------------------------------------------------------
def _bn_apply_kernel(y_ref, scale_ref, shift_ref, out_ref):
    # y_ref/out_ref: (1, H, W*C); scale/shift: (1, W*C), broadcast over rows.
    out_ref[0] = y_ref[0] * scale_ref[...] + shift_ref[...]


# ----------------------------------------------------------------------------
# Weight transform: ConvTranspose2d weight -> width-Toeplitz forward-conv weight
# ----------------------------------------------------------------------------
def _toeplitz_weight(w_deconv, W):
    """(C_in, C_out, 3, 3) deconv weight -> (3, W*C, W*C) Toeplitz matrices."""
    C = w_deconv.shape[0]
    # Equivalent forward-conv weight in HWIO: Wc[kh, kw, ci, co] = Wd[ci, co, 2-kh, 2-kw]
    wc = jnp.transpose(jnp.flip(w_deconv, axis=(2, 3)), (2, 3, 0, 1)).astype(jnp.float32)
    mats = []
    for kh in range(3):
        t_kh = jnp.zeros((W, C, W, C), dtype=jnp.float32)
        for kw in range(3):
            # Input column wi contributes to output column wo when wi == wo + (kw - 1);
            # the SAME-padding in W is implicit in the band truncation.
            band = jnp.eye(W, dtype=jnp.float32, k=1 - kw)        # band[wi, wo]
            t_kh = t_kh + jnp.einsum('ab,cd->acbd', band, wc[kh, kw])
        mats.append(t_kh.reshape(W * C, W * C))
    return jnp.stack(mats, axis=0)


# ----------------------------------------------------------------------------
# Forward wrapper
# ----------------------------------------------------------------------------
@functools.partial(jax.jit, static_argnames=("negative_slope", "eps"))
def res_block_deconv_part(x_nchw, w_deconv, gamma, beta,
                          negative_slope: float = 0.02, eps: float = 1e-5):
    """x_nchw: (N,C,H,W); w_deconv: (C,C,3,3); gamma/beta: (C,). Returns (N,C,H,W)."""
    N, C, H, W = x_nchw.shape
    WC = W * C

    # Single layout transform to the lane-dense internal layout (N, H, W*C).
    x2 = jnp.transpose(x_nchw, (0, 2, 3, 1)).reshape(N, H, WC).astype(jnp.float32)

    t = _toeplitz_weight(w_deconv, W)                    # (3, W*C, W*C)

    # VMEM budget: double-buffered per-image tiles + resident weight (+ headroom).
    tile_bytes = 4 * (2 * (2 * H * WC + 2 * WC) + 3 * WC * WC)
    vmem_limit = int(min(max(2 * tile_bytes, 4 * 1024 * 1024), 32 * 1024 * 1024))
    cparams = pltpu.CompilerParams(
        dimension_semantics=("parallel",),
        vmem_limit_bytes=vmem_limit,
    )

    conv_kernel = functools.partial(_conv_stats_kernel,
                                    negative_slope=negative_slope)
    y, s1, s2 = pl.pallas_call(
        conv_kernel,
        grid=(N,),
        in_specs=[
            pl.BlockSpec((1, H, WC), lambda n: (n, 0, 0)),
            pl.BlockSpec((3, WC, WC), lambda n: (0, 0, 0)),
        ],
        out_specs=(
            pl.BlockSpec((1, H, WC), lambda n: (n, 0, 0)),
            pl.BlockSpec((1, 1, WC), lambda n: (n, 0, 0)),
            pl.BlockSpec((1, 1, WC), lambda n: (n, 0, 0)),
        ),
        out_shape=(
            jax.ShapeDtypeStruct((N, H, WC), jnp.float32),
            jax.ShapeDtypeStruct((N, 1, WC), jnp.float32),
            jax.ShapeDtypeStruct((N, 1, WC), jnp.float32),
        ),
        compiler_params=cparams,
    )(x2, t)

    # Finalize BatchNorm statistics (tiny O(W*C) reduction; training-mode batch
    # stats: biased variance over N, H, W).
    m_total = float(N * H * W)
    sum_c = jnp.sum(s1.reshape(N, W, C), axis=(0, 1))
    sq_c = jnp.sum(s2.reshape(N, W, C), axis=(0, 1))
    mean = sum_c / m_total
    var = jnp.maximum(sq_c / m_total - mean * mean, 0.0)
    inv = jax.lax.rsqrt(var + eps)
    scale_c = gamma.astype(jnp.float32) * inv
    shift_c = beta.astype(jnp.float32) - mean * scale_c
    scale_wc = jnp.tile(scale_c, W).reshape(1, WC)       # lane index = w*C + c
    shift_wc = jnp.tile(shift_c, W).reshape(1, WC)

    out2 = pl.pallas_call(
        _bn_apply_kernel,
        grid=(N,),
        in_specs=[
            pl.BlockSpec((1, H, WC), lambda n: (n, 0, 0)),
            pl.BlockSpec((1, WC), lambda n: (0, 0)),
            pl.BlockSpec((1, WC), lambda n: (0, 0)),
        ],
        out_specs=pl.BlockSpec((1, H, WC), lambda n: (n, 0, 0)),
        out_shape=jax.ShapeDtypeStruct((N, H, WC), jnp.float32),
        compiler_params=cparams,
    )(y, scale_wc, shift_wc)

    # Back to the PyTorch NCHW contract (single transform).
    return jnp.transpose(out2.reshape(N, H, W, C), (0, 3, 1, 2))


# ----------------------------------------------------------------------------
# Pure-JAX reference (same ConvTranspose<->Conv equivalence, lax conv + BN)
# ----------------------------------------------------------------------------
def _reference(x_nchw, w_deconv, gamma, beta,
               negative_slope: float = 0.02, eps: float = 1e-5):
    N, C, H, W = x_nchw.shape
    x = jnp.transpose(x_nchw, (0, 2, 3, 1)).astype(jnp.float32)
    a = jnp.where(x >= 0, x, x * negative_slope)
    w_conv = jnp.transpose(jnp.flip(w_deconv, axis=(2, 3)), (2, 3, 0, 1)).astype(jnp.float32)
    y = jax.lax.conv_general_dilated(
        a, w_conv, (1, 1), "SAME",
        dimension_numbers=("NHWC", "HWIO", "NHWC"))
    mean = jnp.mean(y, axis=(0, 1, 2), keepdims=True)
    var = jnp.mean((y - mean) ** 2, axis=(0, 1, 2), keepdims=True)
    out = (y - mean) * jax.lax.rsqrt(var + eps) * gamma.reshape(1, 1, 1, C) \
          + beta.reshape(1, 1, 1, C)
    return jnp.transpose(out, (0, 3, 1, 2))


if __name__ == "__main__":
    key = jax.random.PRNGKey(0)
    k_x, k_w, k_g, k_b = jax.random.split(key, 4)

    N, C, H, W = 2, 4, 16, 16
    x = jax.random.normal(k_x, (N, C, H, W), dtype=jnp.float32)
    # ConvTranspose2d(C, C, 3, stride=1, padding=1, bias=False) weight: (C_in, C_out, 3, 3)
    w_deconv = 0.1 * jax.random.normal(k_w, (C, C, 3, 3), dtype=jnp.float32)
    # BatchNorm2d affine params (perturbed from default init to exercise the path).
    gamma = 1.0 + 0.1 * jax.random.normal(k_g, (C,), dtype=jnp.float32)
    beta = 0.1 * jax.random.normal(k_b, (C,), dtype=jnp.float32)

    out = res_block_deconv_part(x, w_deconv, gamma, beta)
    out = jax.block_until_ready(out)

    ref = _reference(x, w_deconv, gamma, beta)
    assert out.shape == (N, C, H, W), out.shape
    max_diff = float(jnp.max(jnp.abs(out - ref)))
    assert jnp.allclose(out, ref, rtol=1e-3, atol=2e-4), f"max abs diff {max_diff}"

    print("KERNEL_OK")
</pallas_src>

<mosaic_0001>
module attributes {stable_mosaic.version = 11 : i64} {
  func.func @_conv_stats_kernel(%arg0: i32, %arg1: memref<1x16x64xf32, #tpu.memory_space<vmem>>, %arg2: memref<3x64x64xf32, #tpu.memory_space<vmem>>, %arg3: memref<1x16x64xf32, #tpu.memory_space<vmem>>, %arg4: memref<1x1x64xf32, #tpu.memory_space<vmem>>, %arg5: memref<1x1x64xf32, #tpu.memory_space<vmem>>) attributes {dimension_semantics = [#tpu.dimension_semantics<parallel>], iteration_bounds = array<i64: 2>, scalar_prefetch = 0 : i64, scratch_operands = 0 : i64, tpu.core_type = #tpu.core_type<tc>, window_params = [{transform_indices = @transform_0, window_bounds = array<i64: 1, 16, 64>}, {pipeline_mode = #tpu.pipeline_mode<synchronous>, transform_indices = @transform_1, window_bounds = array<i64: 3, 64, 64>}, {transform_indices = @transform_2, window_bounds = array<i64: 1, 16, 64>}, {transform_indices = @transform_3, window_bounds = array<i64: 1, 1, 64>}, {transform_indices = @transform_4, window_bounds = array<i64: 1, 1, 64>}]} {
    %c0 = arith.constant 0 : index
    %c0_0 = arith.constant 0 : index
    %c0_1 = arith.constant 0 : index
    %0 = vector.load %arg1[%c0, %c0_0, %c0_1] : memref<1x16x64xf32, #tpu.memory_space<vmem>>, vector<1x16x64xf32>
    %1 = vector.shape_cast %0 : vector<1x16x64xf32> to vector<16x64xf32>
    %cst = arith.constant 0.000000e+00 : f32
    %2 = vector.broadcast %cst : f32 to vector<16x64xf32>
    %3 = arith.cmpf oge, %1, %2 : vector<16x64xf32>
    %cst_2 = arith.constant 2.000000e-02 : f32
    %4 = vector.broadcast %cst_2 : f32 to vector<16x64xf32>
    %5 = arith.mulf %1, %4 : vector<16x64xf32>
    %6 = arith.select %3, %1, %5 : vector<16x64xi1>, vector<16x64xf32>
    %cst_3 = arith.constant 0.000000e+00 : f32
    %7 = vector.broadcast %cst_3 : f32 to vector<1x64xf32>
    %c1 = arith.constant 1 : index
    %c0_4 = arith.constant 0 : index
    %c0_5 = arith.constant 0 : index
    %8 = vector.load %arg2[%c1, %c0_4, %c0_5] : memref<3x64x64xf32, #tpu.memory_space<vmem>>, vector<1x64x64xf32>
    %9 = vector.shape_cast %8 : vector<1x64x64xf32> to vector<64x64xf32>
    %cst_6 = arith.constant dense<0.000000e+00> : vector<16x64xf32>
    %10 = tpu.matmul %6, %9, %cst_6 {dimension_numbers = #tpu.dot_dimension_numbers<[1], [0], [0], [1], [0, 0, 1, 1], [], []>} : vector<16x64xf32>, vector<64x64xf32>, vector<16x64xf32> -> vector<16x64xf32>
    %c0_7 = arith.constant 0 : index
    %c0_8 = arith.constant 0 : index
    %c0_9 = arith.constant 0 : index
    %11 = vector.load %arg2[%c0_7, %c0_8, %c0_9] : memref<3x64x64xf32, #tpu.memory_space<vmem>>, vector<1x64x64xf32>
    %12 = vector.shape_cast %11 : vector<1x64x64xf32> to vector<64x64xf32>
    %cst_10 = arith.constant dense<0.000000e+00> : vector<16x64xf32>
    %13 = tpu.matmul %6, %12, %cst_10 {dimension_numbers = #tpu.dot_dimension_numbers<[1], [0], [0], [1], [0, 0, 1, 1], [], []>} : vector<16x64xf32>, vector<64x64xf32>, vector<16x64xf32> -> vector<16x64xf32>
    %14 = vector.extract_strided_slice %13 {offsets = [0, 0], sizes = [15, 64], strides = [1, 1]} : vector<16x64xf32> to vector<15x64xf32>
    %15 = tpu.concatenate %7, %14 in 0 : vector<1x64xf32>, vector<15x64xf32> -> vector<16x64xf32>
    %16 = arith.addf %10, %15 : vector<16x64xf32>
    %c2 = arith.constant 2 : index
    %c0_11 = arith.constant 0 : index
    %c0_12 = arith.constant 0 : index
    %17 = vector.load %arg2[%c2, %c0_11, %c0_12] : memref<3x64x64xf32, #tpu.memory_space<vmem>>, vector<1x64x64xf32>
    %18 = vector.shape_cast %17 : vector<1x64x64xf32> to vector<64x64xf32>
    %cst_13 = arith.constant dense<0.000000e+00> : vector<16x64xf32>
    %19 = tpu.matmul %6, %18, %cst_13 {dimension_numbers = #tpu.dot_dimension_numbers<[1], [0], [0], [1], [0, 0, 1, 1], [], []>} : vector<16x64xf32>, vector<64x64xf32>, vector<16x64xf32> -> vector<16x64xf32>
    %20 = vector.extract_strided_slice %19 {offsets = [1, 0], sizes = [15, 64], strides = [1, 1]} : vector<16x64xf32> to vector<15x64xf32>
    %21 = tpu.concatenate %20, %7 in 0 : vector<15x64xf32>, vector<1x64xf32> -> vector<16x64xf32>
    %22 = arith.addf %16, %21 : vector<16x64xf32>
    %c0_14 = arith.constant 0 : index
    %c0_15 = arith.constant 0 : index
    %c0_16 = arith.constant 0 : index
    %23 = vector.load %arg3[%c0_14, %c0_15, %c0_16] : memref<1x16x64xf32, #tpu.memory_space<vmem>>, vector<1x16x64xf32>
    %24 = vector.shape_cast %23 : vector<1x16x64xf32> to vector<16x64xf32>
    %25 = vector.shape_cast %22 : vector<16x64xf32> to vector<1x16x64xf32>
    tpu.vector_store %arg3[%c0_14, %c0_15, %c0_16], %25 {strides = array<i32>} : memref<1x16x64xf32, #tpu.memory_space<vmem>>, vector<1x16x64xf32>,
    %cst_17 = arith.constant dense<0.000000e+00> : vector<64xf32>
    %26 = vector.multi_reduction <add>, %22, %cst_17 [0] : vector<16x64xf32> to vector<64xf32>
    %27 = vector.shape_cast %26 : vector<64xf32> to vector<1x64xf32>
    %c0_18 = arith.constant 0 : index
    %c0_19 = arith.constant 0 : index
    %c0_20 = arith.constant 0 : index
    %28 = vector.load %arg4[%c0_18, %c0_19, %c0_20] : memref<1x1x64xf32, #tpu.memory_space<vmem>>, vector<1x1x64xf32>
    %29 = vector.shape_cast %28 : vector<1x1x64xf32> to vector<1x64xf32>
    %30 = vector.shape_cast %27 : vector<1x64xf32> to vector<1x1x64xf32>
    tpu.vector_store %arg4[%c0_18, %c0_19, %c0_20], %30 {strides = array<i32>} : memref<1x1x64xf32, #tpu.memory_space<vmem>>, vector<1x1x64xf32>,
    %31 = arith.mulf %22, %22 : vector<16x64xf32>
    %cst_21 = arith.constant dense<0.000000e+00> : vector<64xf32>
    %32 = vector.multi_reduction <add>, %31, %cst_21 [0] : vector<16x64xf32> to vector<64xf32>
    %33 = vector.shape_cast %32 : vector<64xf32> to vector<1x64xf32>
    %c0_22 = arith.constant 0 : index
    %c0_23 = arith.constant 0 : index
    %c0_24 = arith.constant 0 : index
    %34 = vector.load %arg5[%c0_22, %c0_23, %c0_24] : memref<1x1x64xf32, #tpu.memory_space<vmem>>, vector<1x1x64xf32>
    %35 = vector.shape_cast %34 : vector<1x1x64xf32> to vector<1x64xf32>
    %36 = vector.shape_cast %33 : vector<1x64xf32> to vector<1x1x64xf32>
    tpu.vector_store %arg5[%c0_22, %c0_23, %c0_24], %36 {strides = array<i32>} : memref<1x1x64xf32, #tpu.memory_space<vmem>>, vector<1x1x64xf32>,
    return
  }
  func.func @transform_0(%arg0: i32) -> (i32, i32, i32) {
    %c0_i32 = arith.constant 0 : i32
    %c0_i32_0 = arith.constant 0 : i32
    %c0_i32_1 = arith.constant 0 : i32
    return %arg0, %c0_i32, %c0_i32_0 : i32, i32, i32
  }
  func.func @transform_1(%arg0: i32) -> (i32, i32, i32) {
    %c0_i32 = arith.constant 0 : i32
    %c0_i32_0 = arith.constant 0 : i32
    %c0_i32_1 = arith.constant 0 : i32
    %c0_i32_2 = arith.constant 0 : i32
    return %c0_i32, %c0_i32_0, %c0_i32_1 : i32, i32, i32
  }
  func.func @transform_2(%arg0: i32) -> (i32, i32, i32) {
    %c0_i32 = arith.constant 0 : i32
    %c0_i32_0 = arith.constant 0 : i32
    %c0_i32_1 = arith.constant 0 : i32
    return %arg0, %c0_i32, %c0_i32_0 : i32, i32, i32
  }
  func.func @transform_3(%arg0: i32) -> (i32, i32, i32) {
    %c0_i32 = arith.constant 0 : i32
    %c0_i32_0 = arith.constant 0 : i32
    %c0_i32_1 = arith.constant 0 : i32
    return %arg0, %c0_i32, %c0_i32_0 : i32, i32, i32
  }
  func.func @transform_4(%arg0: i32) -> (i32, i32, i32) {
    %c0_i32 = arith.constant 0 : i32
    %c0_i32_0 = arith.constant 0 : i32
    %c0_i32_1 = arith.constant 0 : i32
    return %arg0, %c0_i32, %c0_i32_0 : i32, i32, i32
  }
}

module attributes {stable_mosaic.version = 11 : i64} {
  func.func @_bn_apply_kernel(%arg0: i32, %arg1: memref<1x16x64xf32, #tpu.memory_space<vmem>>, %arg2: memref<1x64xf32, #tpu.memory_space<vmem>>, %arg3: memref<1x64xf32, #tpu.memory_space<vmem>>, %arg4: memref<1x16x64xf32, #tpu.memory_space<vmem>>) attributes {dimension_semantics = [#tpu.dimension_semantics<parallel>], iteration_bounds = array<i64: 2>, scalar_prefetch = 0 : i64, scratch_operands = 0 : i64, tpu.core_type = #tpu.core_type<tc>, window_params = [{transform_indices = @transform_0, window_bounds = array<i64: 1, 16, 64>}, {pipeline_mode = #tpu.pipeline_mode<synchronous>, transform_indices = @transform_1, window_bounds = array<i64: 1, 64>}, {pipeline_mode = #tpu.pipeline_mode<synchronous>, transform_indices = @transform_2, window_bounds = array<i64: 1, 64>}, {transform_indices = @transform_3, window_bounds = array<i64: 1, 16, 64>}]} {
    %c0 = arith.constant 0 : index
    %c0_0 = arith.constant 0 : index
    %c0_1 = arith.constant 0 : index
    %0 = vector.load %arg1[%c0, %c0_0, %c0_1] : memref<1x16x64xf32, #tpu.memory_space<vmem>>, vector<1x16x64xf32>
    %1 = vector.shape_cast %0 : vector<1x16x64xf32> to vector<16x64xf32>
    %c0_2 = arith.constant 0 : index
    %c0_3 = arith.constant 0 : index
    %2 = vector.load %arg2[%c0_2, %c0_3] : memref<1x64xf32, #tpu.memory_space<vmem>>, vector<1x64xf32>
    %3 = vector.broadcast %2 : vector<1x64xf32> to vector<16x64xf32>
    %4 = arith.mulf %1, %3 : vector<16x64xf32>
    %c0_4 = arith.constant 0 : index
    %c0_5 = arith.constant 0 : index
    %5 = vector.load %arg3[%c0_4, %c0_5] : memref<1x64xf32, #tpu.memory_space<vmem>>, vector<1x64xf32>
    %6 = vector.broadcast %5 : vector<1x64xf32> to vector<16x64xf32>
    %7 = arith.addf %4, %6 : vector<16x64xf32>
    %c0_6 = arith.constant 0 : index
    %c0_7 = arith.constant 0 : index
    %c0_8 = arith.constant 0 : index
    %8 = vector.load %arg4[%c0_6, %c0_7, %c0_8] : memref<1x16x64xf32, #tpu.memory_space<vmem>>, vector<1x16x64xf32>
    %9 = vector.shape_cast %8 : vector<1x16x64xf32> to vector<16x64xf32>
    %10 = vector.shape_cast %7 : vector<16x64xf32> to vector<1x16x64xf32>
    tpu.vector_store %arg4[%c0_6, %c0_7, %c0_8], %10 {strides = array<i32>} : memref<1x16x64xf32, #tpu.memory_space<vmem>>, vector<1x16x64xf32>,
    return
  }
  func.func @transform_0(%arg0: i32) -> (i32, i32, i32) {
    %c0_i32 = arith.constant 0 : i32
    %c0_i32_0 = arith.constant 0 : i32
    %c0_i32_1 = arith.constant 0 : i32
    return %arg0, %c0_i32, %c0_i32_0 : i32, i32, i32
  }
  func.func @transform_1(%arg0: i32) -> (i32, i32) {
    %c0_i32 = arith.constant 0 : i32
    %c0_i32_0 = arith.constant 0 : i32
    %c0_i32_1 = arith.constant 0 : i32
    return %c0_i32, %c0_i32_0 : i32, i32
  }
  func.func @transform_2(%arg0: i32) -> (i32, i32) {
    %c0_i32 = arith.constant 0 : i32
    %c0_i32_0 = arith.constant 0 : i32
    %c0_i32_1 = arith.constant 0 : i32
    return %c0_i32, %c0_i32_0 : i32, i32
  }
  func.func @transform_3(%arg0: i32) -> (i32, i32, i32) {
    %c0_i32 = arith.constant 0 : i32
    %c0_i32_0 = arith.constant 0 : i32
    %c0_i32_1 = arith.constant 0 : i32
    return %arg0, %c0_i32, %c0_i32_0 : i32, i32, i32
  }
}

</mosaic_0001>

<bundles_post_ra>
// kernel: tile.13
= control target key start
LH: loop header
LB: loop body
LE: loop exit
PB: predicated region body
PF: predicated region fallthrough
CT: control target
= control target key end

     0   :  { %s28_s0 = inlined_call_operand.vmem [shape: f32[4], index: 0, kind: input, shape index: {}]   ;;  %s29_s1 = inlined_call_operand.vmem [shape: f32[16,4], index: 1, kind: output, shape index: {}]  }
   0x1   :  { %v4_v0 = vld [vmem:[%s28_s0] ss:$0 sm:$0xff] }
   0x2   :  { %5 = vst [vmem:[%s29_s1] sm:$0xff] %v4_v0 }
   0x3   :  { %8 = vst [vmem:[%s29_s1 + $0x8] sm:$0xff] %v4_v0 }

// kernel: tile.14
= control target key start
LH: loop header
LB: loop body
LE: loop exit
PB: predicated region body
PF: predicated region fallthrough
CT: control target
= control target key end

     0   :  { %s131_s10 = smov 60   ;;  %s132_s11 = smov 52   ;;  %vm3_vm0 = vcmask 31744   ;;  %vm9_vm1 = vcmask 523744   ;;  %vm15_vm2 = vcmask 490944   ;;  %vm21_vm3 = vcmask 458144   ;;  %s207_s0 = inlined_call_operand.vmem [shape: f32[16,4], index: 0, kind: input, shape index: {}]   ;;  %s208_s1 = inlined_call_operand.vmem [shape: f32[1,64], index: 1, kind: output, shape index: {}]  }
   0x1   :  { %v101_v0 = vld [vmem:[%s207_s0 + $0xf] sm:$0x1]   ;;  %v103_v1 = vld [vmem:[%s207_s0 + $0xd] sm:$0x1]   ;;  %v105_v2 = vld [vmem:[%s207_s0 + $0xb] sm:$0x1]  }
   0x2   :  { %7 = vrot.lane.b32.xlu0 %v101_v0, %s131_s10  ;;  %19 = vrot.lane.b32.xlu1 %v103_v1, %s132_s11  ;;  %s133_s14 = smov 44   ;;  %v102_v3 = vld [vmem:[%s207_s0 + $0xe] sm:$0x1]   ;;  %v104_v4 = vld [vmem:[%s207_s0 + $0xc] sm:$0x1]   ;;  %s134_s19 = smov 56  }
   0x3   :  { %31 = vrot.lane.b32.xlu2 %v105_v2, %s133_s14  ;;  %s135_s20 = smov 48   ;;  %v106_v5 = vld [vmem:[%s207_s0 + $0xa] sm:$0x1]   ;;  %s136_s23 = smov 40   ;;  %v107_v6 = vld [vmem:[%s207_s0 + $0x9] sm:$0x1]  }
   0x4   :  { %v108_v7 = vld [vmem:[%s207_s0 + $0x8] sm:$0x1]   ;;  %s137_s28 = smov 36   ;;  %s138_s29 = smov 32   ;;  %v109_v8 = vld [vmem:[%s207_s0 + $0x7] sm:$0x1]  }
   0x5   :  { %s139_s3 = smov 28   ;;  %v110_v9 = vld [vmem:[%s207_s0 + $0x6] sm:$0x1]   ;;  %v111_v10 = vld [vmem:[%s207_s0 + $0x5] sm:$0x1]   ;;  %s140_s8 = smov 24  }
   0x6   :  { %s141_s9 = smov 20   ;;  %v112_v11 = vld [vmem:[%s207_s0 + $0x4] sm:$0x1]   ;;  %s142_s12 = smov 16   ;;  %v113_v12 = vld [vmem:[%s207_s0 + $0x3] sm:$0x1]  }
   0x7   :  { %v114_v13 = vld [vmem:[%s207_s0 + $0x2] sm:$0x1]   ;;  %s143_s17 = smov 12   ;;  %s144_s18 = smov 8   ;;  %v115_v14 = vld [vmem:[%s207_s0 + $0x1] sm:$0x1]  }
   0x8   :  { %s145_s21 = smov 4   ;;  %v2_v15 = vld [vmem:[%s207_s0] sm:$0x1]   ;;  %vm27_vm4 = vcmask 425344   ;;  %vm33_vm5 = vcmask 392544   ;;  %vm39_vm6 = vcmask 359744  }
   0x9   :  { %4 = vst.msk [vmem:[#allocation0] sm:$0x1] %vm3_vm0, %v2_v15   ;;  %vm45_vm7 = vcmask 326944   ;;  %vm51_vm8 = vcmask 294144   ;;  %vm57_vm9 = vcmask 261344   ;;  %vm63_vm10 = vcmask 228544  }
   0xa   :  { %13 = vrot.lane.b32.xlu0 %v102_v3, %s134_s19  ;;  %25 = vrot.lane.b32.xlu1 %v104_v4, %s135_s20  ;;  %vm69_vm11 = vcmask 195744   ;;  %vm75_vm12 = vcmask 162944   ;;  %vm81_vm13 = vcmask 130144   ;;  %vm87_vm14 = vcmask 97344  }
   0xb   :  { %37 = vrot.lane.b32.xlu2 %v106_v5, %s136_s23  ;;  %vm93_vm15 = vcmask 64544  }
  0x12   :  { %43 = vrot.lane.b32.xlu0 %v107_v6, %s137_s28  ;;  %49 = vrot.lane.b32.xlu1 %v108_v7, %s138_s29 }
  0x13   :  { %55 = vrot.lane.b32.xlu2 %v109_v8, %s139_s3 }
  0x1a   :  { %61 = vrot.lane.b32.xlu0 %v110_v9, %s140_s8  ;;  %67 = vrot.lane.b32.xlu1 %v111_v10, %s141_s9 }
  0x1b   :  { %73 = vrot.lane.b32.xlu2 %v112_v11, %s142_s12 }
  0x22   :  { %79 = vrot.lane.b32.xlu0 %v113_v12, %s143_s17  ;;  %85 = vrot.lane.b32.xlu1 %v114_v13, %s144_s18 }
  0x23   :  { %91 = vrot.lane.b32.xlu2 %v115_v14, %s145_s21 }
  0x5d   :  { %v32_v16 = vpop.permute.xlu2 %31  }
  0x65   :  { %v38_v17 = vpop.permute.xlu2 %37  }
  0x6d   :  { %v56_v18 = vpop.permute.xlu2 %55  }
  0x74   :  { %v8_v19 = vpop.permute.xlu0 %7   ;;  %v20_v20 = vpop.permute.xlu1 %19  }
  0x75   :  { %10 = vst.msk [vmem:[#allocation0] sm:$0x1] %vm9_vm1, %v8_v19   ;;  %v74_v21 = vpop.permute.xlu2 %73  }
  0x7c   :  { %v14_v22 = vpop.permute.xlu0 %13   ;;  %v26_v23 = vpop.permute.xlu1 %25  }
  0x7d   :  { %16 = vst.msk [vmem:[#allocation0] sm:$0x1] %vm15_vm2, %v14_v22   ;;  %v92_v24 = vpop.permute.xlu2 %91  }
  0x7e   :  { %22 = vst.msk [vmem:[#allocation0] sm:$0x1] %vm21_vm3, %v20_v20  }
  0x7f   :  { %28 = vst.msk [vmem:[#allocation0] sm:$0x1] %vm27_vm4, %v26_v23  }
  0x80   :  { %34 = vst.msk [vmem:[#allocation0] sm:$0x1] %vm33_vm5, %v32_v16  }
  0x81   :  { %40 = vst.msk [vmem:[#allocation0] sm:$0x1] %vm39_vm6, %v38_v17  }
  0x84   :  { %v44_v25 = vpop.permute.xlu0 %43   ;;  %v50_v26 = vpop.permute.xlu1 %49  }
  0x85   :  { %46 = vst.msk [vmem:[#allocation0] sm:$0x1] %vm45_vm7, %v44_v25  }
  0x86   :  { %52 = vst.msk [vmem:[#allocation0] sm:$0x1] %vm51_vm8, %v50_v26  }
  0x87   :  { %58 = vst.msk [vmem:[#allocation0] sm:$0x1] %vm57_vm9, %v56_v18  }
  0x8c   :  { %v62_v27 = vpop.permute.xlu0 %61   ;;  %v68_v28 = vpop.permute.xlu1 %67  }
  0x8d   :  { %64 = vst.msk [vmem:[#allocation0] sm:$0x1] %vm63_vm10, %v62_v27  }
  0x8e   :  { %70 = vst.msk [vmem:[#allocation0] sm:$0x1] %vm69_vm11, %v68_v28  }
  0x8f   :  { %76 = vst.msk [vmem:[#allocation0] sm:$0x1] %vm75_vm12, %v74_v21  }
  0x94   :  { %v80_v29 = vpop.permute.xlu0 %79   ;;  %v86_v30 = vpop.permute.xlu1 %85  }
  0x95   :  { %82 = vst.msk [vmem:[#allocation0] sm:$0x1] %vm81_vm13, %v80_v29  }
  0x96   :  { %88 = vst.msk [vmem:[#allocation0] sm:$0x1] %vm87_vm14, %v86_v30  }
  0x97   :  { %94 = vst.msk [vmem:[#allocation0] sm:$0x1] %vm93_vm15, %v92_v24  }
  0x9e   :  { %v97_v31 = vld [vmem:[#allocation0] sm:$0x1] }
  0x9f   :  { %100 = vst [vmem:[%s208_s1] sm:$0x1] %v97_v31 }

// kernel: res_block_deconv_part.3
= control target key start
LH: loop header
LB: loop body
LE: loop exit
PB: predicated region body
PF: predicated region fallthrough
CT: control target
= control target key end

     0   :  { %s270_s12 = smov 0   ;;  %s306_s0 = inlined_call_operand.vmem [shape: f32[2,16,64], index: 0, kind: input, shape index: {}]   ;;  %s307_s1 = inlined_call_operand.vmem [shape: f32[1,64], index: 1, kind: input, shape index: {}]   ;;  %s308_s2 = inlined_call_operand.vmem [shape: f32[1,64], index: 2, kind: input, shape index: {}]   ;;  %s309_s3 = inlined_call_operand.vmem [shape: f32[2,16,64], index: 3, kind: output, shape index: {}]  }
   0x1 LB: > { %s243_s13 = sadd.s32 4294967295, %s272_s12   ;;  %p247_p0 = scmp.ge.s32.totalorder %s272_s12, 1  ;;  %s272_s12 = sphi %s270_s12, %s13_s12  }
   0x2   : > { %p137_p1 = scmp.lt.s32.totalorder %s272_s12, 3 }
   0x4   : > { %p138_p2 = pnand %p247_p0, %p137_p1 }
   0x5   : > { %p161_p3 = scmp.lt.s32.totalorder (!%p138_p2), %s243_s13, 1 }
   0x6   : > { %141 = sbr.rel (%p138_p2) target bundleno = 21 (0x15), region = 32 }
   0xb   : > { %s311_s13 = smov (!%p161_p3, %s243_s13), 1  ;;  %v264_v0 = vld [vmem:[%s307_s1] ss:$0 sm:$0xff]  ;;  %vm185_vm0 = vcmask 523264  }
   0xc   : > { %s254_s16 = sshll.u32 %s311_s13, 4  ;;  %v265_v1 = vld [vmem:[%s308_s2] ss:$0 sm:$0xff] }
   0xd   : > { %s165_s19 = scalar_lea.vmem %s306_s0, %s254_s16  ;;  %s170_s24 = scalar_lea.vmem %s309_s3, %s254_s16 }
   0xe   : > { %v171_v2 = vld [vmem:[%s165_s19] sm:$0xff]  ;;  %v172_v3 = vld [vmem:[%s165_s19 + $0x8] sm:$0xff] }
   0xf   : > { %v177_v4 = vmul.f32 %v264_v0, %v171_v2  ;;  %v178_v5 = vmul.f32 %v264_v0, %v172_v3 }
  0x11   : > { %v183_v6 = vadd.f32 %v265_v1, %v177_v4  ;;  %v184_v7 = vadd.f32 %v265_v1, %v178_v5 }
  0x13   : > { %186 = vst.msk [vmem:[%s170_s24] sm:$0xff] %vm185_vm0, %v183_v6 }
  0x14   : > { %187 = vst.msk [vmem:[%s170_s24 + $0x8] sm:$0xff] %vm185_vm0, %v184_v7 }
  0x15 PF: > { %s13_s12 = sadd.s32 1, %s272_s12  }
  0x16   : > { %p10_p4 = scmp.ge.s32.totalorder %s13_s12, 4  }
  0x18   :  { %12 = sbr.rel (!%p10_p4) target bundleno = 1 (0x1), region = 62 }

// kernel: res_block_deconv_part.2
= control target key start
LH: loop header
LB: loop body
LE: loop exit
PB: predicated region body
PF: predicated region fallthrough
CT: control target
= control target key end

     0   :  { %s559_s15 = smov 0   ;;  %s675_s0 = inlined_call_operand.vmem [shape: f32[2,16,64], index: 0, kind: input, shape index: {}]   ;;  %s676_s1 = inlined_call_operand.vmem [shape: f32[3,64,64], index: 1, kind: input, shape index: {}]   ;;  %s677_s2 = inlined_call_operand.vmem [shape: f32[2,16,64], index: 2, kind: output, shape index: {0}]   ;;  %s678_s3 = inlined_call_operand.vmem [shape: f32[2,1,64], index: 3, kind: output, shape index: {1}]   ;;  %s679_s4 = inlined_call_operand.vmem [shape: f32[2,1,64], index: 4, kind: output, shape index: {2}]  }
   0x1 LB: > { %s475_s16 = sadd.s32 4294967295, %s532_s15   ;;  %p479_p0 = scmp.ge.s32.totalorder %s532_s15, 1  ;;  %s532_s15 = sphi %s559_s15, %s15_s15  }
   0x2   : > { %p167_p1 = scmp.lt.s32.totalorder %s532_s15, 3 }
   0x4   : > { %p168_p2 = pnand %p479_p0, %p167_p1 }
   0x5   : > { %p199_p3 = scmp.lt.s32.totalorder (!%p168_p2), %s475_s16, 1 }
   0x6   : > { %171 = sbr.rel (%p168_p2) target bundleno = 190 (0xbe), region = 28 }
   0xb   : > { %v503_v0 = vld [vmem:[%s676_s1 + $0xb8] sm:$0xff]  ;;  %v502_v1 = vld [vmem:[%s676_s1 + $0xb0] sm:$0xff]  ;;  %v501_v4 = vld [vmem:[%s676_s1 + $0xa8] sm:$0xff]  ;;  %s681_s16 = smov (!%p199_p3, %s475_s16), 1  ;;  %vm240_vm2 = vcmask 523264   ;;  %vm272_vm3 = vcmask 1040384  }
   0xc   : > { %v239_v2 = vld [vmem:[%s676_s1 + $0x38] sm:$0xff]  ;;  %319 = vmatpush.msra.mxu2 %v503_v0  ;;  %v238_v3 = vld [vmem:[%s676_s1 + $0x30] sm:$0xff]  ;;  %v237_v6 = vld [vmem:[%s676_s1 + $0x28] sm:$0xff]  ;;  %s508_s11 = sshll.u32 %s681_s16, 4  ;;  %vm336_vm4 = vcmask 1046528   ;;  %s211_s26 = scalar_lea.vmem %s678_s3, %s681_s16  ;;  %vm356_vm5 = vcmask 516096  }
   0xd   : > { %255 = vmatpush.msra.mxu0 %v239_v2  ;;  %510 = vmatpush.msra.mxu3 %v239_v2  ;;  %v491_v5 = vld [vmem:[%s676_s1 + $0x78] sm:$0xff]  ;;  %v490_v7 = vld [vmem:[%s676_s1 + $0x70] sm:$0xff]  ;;  %v500_v8 = vld [vmem:[%s676_s1 + $0xa0] sm:$0xff]  ;;  %s203_s18 = scalar_lea.vmem %s675_s0, %s508_s11  ;;  %s208_s24 = scalar_lea.vmem %s677_s2, %s508_s11 }
   0xe   : > { %320 = vmatpush.msra.mxu2 %v502_v1  ;;  %287 = vmatpush.msra.mxu1 %v491_v5  ;;  %v236_v9 = vld [vmem:[%s676_s1 + $0x20] sm:$0xff]  ;;  %v489_v10 = vld [vmem:[%s676_s1 + $0x68] sm:$0xff]  ;;  %v499_v11 = vld [vmem:[%s676_s1 + $0x98] sm:$0xff]  ;;  %s214_s29 = scalar_lea.vmem %s679_s4, %s681_s16 }
   0xf   : > { %256 = vmatpush.msra.mxu0 %v238_v3  ;;  %511 = vmatpush.msra.mxu3 %v238_v3  ;;  %v235_v12 = vld [vmem:[%s676_s1 + $0x18] sm:$0xff]  ;;  %v215_v13 = vld [vmem:[%s203_s18] sm:$0xff]  ;;  %v498_v15 = vld [vmem:[%s676_s1 + $0x90] sm:$0xff] }
  0x10   : > { %321 = vmatpush.msra.mxu2 %v501_v4  ;;  %288 = vmatpush.msra.mxu1 %v490_v7  ;;  %v488_v14 = vld [vmem:[%s676_s1 + $0x60] sm:$0xff]  ;;  %v234_v16 = vld [vmem:[%s676_s1 + $0x10] sm:$0xff]  ;;  %v216_v17 = vld [vmem:[%s203_s18 + $0x8] sm:$0xff]  ;;  %v219_v19 = vmul.f32 0.02, %v215_v13  ;;  %vm217_vm0 = vcmp.ge.f32.partialorder %v215_v13, 0.0 }
  0x11   : > { %257 = vmatpush.msra.mxu0 %v237_v6  ;;  %512 = vmatpush.msra.mxu3 %v237_v6  ;;  %v487_v18 = vld [vmem:[%s676_s1 + $0x58] sm:$0xff]  ;;  %v497_v20 = vld [vmem:[%s676_s1 + $0x88] sm:$0xff]  ;;  %v486_v22 = vld [vmem:[%s676_s1 + $0x50] sm:$0xff]  ;;  %v220_v23 = vmul.f32 0.02, %v216_v17  ;;  %vm218_vm1 = vcmp.ge.f32.partialorder %v216_v17, 0.0 }
  0x12   : > { %322 = vmatpush.msra.mxu2 %v500_v8  ;;  %289 = vmatpush.msra.mxu1 %v489_v10  ;;  %v233_v21 = vld [vmem:[%s676_s1 + $0x8] sm:$0xff]  ;;  %v496_v24 = vld [vmem:[%s676_s1 + $0x80] sm:$0xff]  ;;  %v221_v26 = vsel %vm217_vm0, %v215_v13, %v219_v19 }
  0x13   : > { %258 = vmatpush.msra.mxu0 %v236_v9  ;;  %513 = vmatpush.msra.mxu3 %v236_v9  ;;  %v232_v25 = vld [vmem:[%s676_s1] sm:$0xff]  ;;  %v485_v27 = vld [vmem:[%s676_s1 + $0x48] sm:$0xff]  ;;  %v222_v28 = vsel %vm218_vm1, %v216_v17, %v220_v23 }
  0x14   : > { %323 = vmatpush.msra.mxu2 %v499_v11  ;;  %290 = vmatpush.msra.mxu1 %v488_v14  ;;  %v484_v29 = vld [vmem:[%s676_s1 + $0x40] sm:$0xff] }
  0x15   : > { %259 = vmatpush.msra.mxu0 %v235_v12  ;;  %514 = vmatpush.msra.mxu3 %v235_v12 }
  0x16   : > { %324 = vmatpush.msra.mxu2 %v498_v15  ;;  %291 = vmatpush.msra.mxu1 %v487_v18 }
  0x17   : > { %260 = vmatpush.msra.mxu0 %v234_v16  ;;  %515 = vmatpush.msra.mxu3 %v234_v16 }
  0x18   : > { %325 = vmatpush.msra.mxu2 %v497_v20  ;;  %292 = vmatpush.msra.mxu1 %v486_v22 }
  0x19   : > { %261 = vmatpush.msra.mxu0 %v233_v21  ;;  %516 = vmatpush.msra.mxu3 %v233_v21 }
  0x1a   : > { %326 = vmatpush.msra.mxu2 %v496_v24  ;;  %293 = vmatpush.msra.mxu1 %v485_v27 }
  0x1b   : > { %262 = vmatpush.msra.mxu0 %v232_v25  ;;  %504 = vmatmul.msk.f32.vlgmr.msra.gmra.mxu2 %vm240_vm2, %v221_v26 }
  0x1c   : > { %492 = vmatmul.msk.f32.vlgmr.msra.gmra.mxu0 %vm240_vm2, %v221_v26  ;;  %517 = vmatpush.msra.mxu3 %v232_v25 }
  0x1d   : > { %493 = vmatmul.msk.f32.vlgmr.msra.gmra.mxu3 %vm240_vm2, %v222_v28  ;;  %294 = vmatpush.msra.mxu1 %v484_v29 }
  0x1e   : > { %494 = vmatmul.msk.f32.vlgmr.msra.gmra.mxu1 %vm240_vm2, %v221_v26 }
  0x23   : > { %505 = vmatmul.msk.f32.gmra.mxu2 %vm240_vm2, %v222_v28 }
  0x26   : > { %495 = vmatmul.msk.f32.gmra.mxu1 %vm240_vm2, %v222_v28 }
  0x99   : > { %v264_v31 = vpop.f32.mrf.mxu0 }
  0x9a   : > { %v273_v34 = vrot.slane %v264_v31, 7 }
  0x9b   : > { %v296_v30 = vpop.f32.mrf.mxu1 }
  0x9c   : > { %v278_v38 = vsel %vm272_vm3, 0.0, %v273_v34 }
  0x9d   : > { %v297_v43 = vadd.f32 %v296_v30, %v278_v38 }
  0x9e   : > { %v328_v32 = vpop.f32.mrf.mxu2 }
  0x9f   : > { %v337_v41 = vrot.slane %v328_v32, 1 }
  0xa0   : > { %v267_v33 = vpop.f32.mrf.mxu3 }
  0xa1   : > { %v274_v35 = vrot.slane %v267_v33, 7 }
  0xa3   : > { %v275_v36 = vsel %vm272_vm3, %v273_v34, %v274_v35  ;;  %v299_v37 = vpop.f32.mrf.mxu1 }
  0xa4   : > { %v300_v40 = vadd.f32 %v299_v37, %v275_v36 }
  0xa6   : > { %v331_v39 = vpop.f32.mrf.mxu2 }
  0xa7   : > { %v338_v42 = vrot.slane %v331_v39, 1 }
  0xa9   : > { %v339_v44 = vsel %vm336_vm4, %v337_v41, %v338_v42  ;;  %v342_v45 = vsel %vm336_vm4, %v338_v42, 0.0 }
  0xaa   : > { %v343_v46 = vadd.f32 %v339_v44, %v297_v43  ;;  %v344_v47 = vadd.f32 %v342_v45, %v300_v40 }
  0xac   : > { %345 = vst.msk [vmem:[%s208_s24] sm:$0xff] %vm240_vm2, %v343_v46  ;;  %v358_v48 = vmul.f32 %v343_v46, %v343_v46  ;;  %v347_v49 = vsel %vm240_vm2, %v343_v46, 0.0  ;;  %v348_v50 = vsel %vm240_vm2, %v344_v47, 0.0  ;;  %v359_v51 = vmul.f32 %v344_v47, %v344_v47 }
  0xad   : > { %346 = vst.msk [vmem:[%s208_s24 + $0x8] sm:$0xff] %vm240_vm2, %v344_v47  ;;  %v349_v52 = vadd.f32 %v348_v50, %v347_v49 }
  0xae   : > { %v360_v53 = vsel %vm240_vm2, %v358_v48, 0.0  ;;  %v361_v54 = vsel %vm240_vm2, %v359_v51, 0.0 }
  0xaf   : > { %v350_v55 = vrot.slane %v349_v52, 4  ;;  %v362_v56 = vadd.f32 %v361_v54, %v360_v53 }
  0xb1   : > { %v351_v57 = vadd.f32 %v350_v55, %v349_v52  ;;  %v363_v58 = vrot.slane %v362_v56, 4 }
  0xb3   : > { %v352_v59 = vrot.slane %v351_v57, 2  ;;  %v364_v60 = vadd.f32 %v363_v58, %v362_v56 }
  0xb5   : > { %v353_v61 = vadd.f32 %v352_v59, %v351_v57  ;;  %v365_v62 = vrot.slane %v364_v60, 2 }
  0xb7   : > { %v354_v63 = vrot.slane %v353_v61, 1  ;;  %v366_v0 = vadd.f32 %v365_v62, %v364_v60 }
  0xb9   : > { %v355_v1 = vadd.f32 %v354_v63, %v353_v61  ;;  %v367_v2 = vrot.slane %v366_v0, 1 }
  0xbb   : > { %357 = vst.msk [vmem:[%s211_s26] sm:$0x1] %vm356_vm5, %v355_v1  ;;  %v368_v3 = vadd.f32 %v367_v2, %v366_v0 }
  0xbd   : > { %369 = vst.msk [vmem:[%s214_s29] sm:$0x1] %vm356_vm5, %v368_v3 }
  0xbe PF: > { %s15_s15 = sadd.s32 1, %s532_s15  }
  0xbf   : > { %p12_p4 = scmp.ge.s32.totalorder %s15_s15, 4  }
  0xc1   :  { %14 = sbr.rel (!%p12_p4) target bundleno = 1 (0x1), region = 84 }

</bundles_post_ra>
